<compile_context>
chip_gen: v5e
topology: v5e:2x2
jax: 0.10.0
libtpu: 0.0.40
codegen_flags: <defaults>
</compile_context>

<pallas_src>
import jax
import jax.numpy as jnp
from jax.experimental import pallas as pl
from jax.experimental.pallas import tpu as pltpu

INPUT_SIZE = 78
HIDDEN = 32
OUTPUT_SIZE = 2

LANES = 4 * HIDDEN          # 128: gate width == one full lane tile
PAD_IN = 128                # feature dim zero-padded 78 -> 128 (one clean MXU K pass)

# Row layout of the packed weight slab (every section starts on an 8-sublane boundary).
R_WIH = 0                   # rows [  0,128): W_ih, 78 real rows, rest zero
R_WHH = R_WIH + PAD_IN      # rows [128,160): W_hh
R_B = R_WHH + HIDDEN        # row   160    : combined LSTM bias (b_ih + b_hh)
R_WOUT = R_B + 8            # rows [168,200): W_out padded to 128 lanes (2 real cols)
R_BOUT = R_WOUT + HIDDEN    # row   200    : b_out padded to 128 lanes
SLAB_ROWS = R_BOUT + 8      # 208 rows total (~104 KB fp32)


def _net_kernel(x_ref, w_ref, o_ref):
    """Whole forward pass in one kernel invocation (no grid)."""
    BT = x_ref.shape[0]                 # static: B * T
    B = o_ref.shape[0]
    T = BT // B
    H = HIDDEN

    # ---- Static sub-views of the single packed parameter slab (1 DMA total). ----
    wih = w_ref[R_WIH:R_WIH + PAD_IN, :]        # (128, 4H)  zero-padded input proj
    whh = w_ref[R_WHH:R_WHH + H, :]             # (H, 4H)    loop-invariant MXU RHS
    b = w_ref[R_B:R_B + 1, :]                   # (1, 4H)    combined LSTM bias
    wout = w_ref[R_WOUT:R_WOUT + H, :]          # (H, 128)   2 real cols, rest zero
    bout = w_ref[R_BOUT:R_BOUT + 1, :]          # (1, 128)

    # ---- Hoisted input projection: all B*T steps in ONE lane-dense MXU matmul. ----
    gx = jnp.dot(x_ref[...], wih, preferred_element_type=jnp.float32) + b   # (B*T, 4H)
    gx = gx.reshape(B, T, 4 * H)        # T % 8 == 0 here -> pure relayout, no copy

    h = jnp.zeros((B, H), jnp.float32)
    c = jnp.zeros((B, H), jnp.float32)

    # ---- Serial recurrence; T is small and static => full unroll. Only the tiny
    # (B,H)@(H,4H) hidden matmul + activations sit on the serial critical path;
    # whh was read once above so its MXU load is not repeated per step.
    # TODO(synk): if T grows beyond a few tens of steps, switch to
    # lax.fori_loop(..., unroll=4) to bound live ranges / instruction memory.
    for t in range(T):
        gates = gx[:, t, :] + jnp.dot(h, whh, preferred_element_type=jnp.float32)
        sg = jax.nn.sigmoid(gates)      # one full-width EUP pass (i, f, o lanes)
        th = jnp.tanh(gates)            # one full-width EUP pass (g lanes)
        i_g = sg[:, 0 * H:1 * H]
        f_g = sg[:, 1 * H:2 * H]
        g_g = th[:, 2 * H:3 * H]
        o_g = sg[:, 3 * H:4 * H]
        c = f_g * c + i_g * g_g
        h = o_g * jnp.tanh(c)

    # ---- Linear head on the last hidden state; lane-padded so the final store is
    # an unmasked lane-dense vst (wrapper slices the 2 real columns). ----
    o_ref[...] = (jnp.dot(h, wout, preferred_element_type=jnp.float32)
                  + bout).astype(o_ref.dtype)


def pack_weights(w_ih, w_hh, bias, w_out, b_out):
    """Pack all parameters into a single (SLAB_ROWS, 128) fp32 slab (one input DMA)."""
    slab = jnp.zeros((SLAB_ROWS, LANES), jnp.float32)
    slab = slab.at[R_WIH:R_WIH + INPUT_SIZE, :].set(w_ih)
    slab = slab.at[R_WHH:R_WHH + HIDDEN, :].set(w_hh)
    slab = slab.at[R_B, :].set(bias.reshape(-1))
    slab = slab.at[R_WOUT:R_WOUT + HIDDEN, :OUTPUT_SIZE].set(w_out)
    slab = slab.at[R_BOUT, :OUTPUT_SIZE].set(b_out.reshape(-1))
    return slab


@jax.jit
def net_forward(x_bf, slab):
    """x_bf: (B, T, INPUT_SIZE) float32, PyTorch batch_first layout."""
    B, T, IN = x_bf.shape
    # Flatten + zero-pad the feature dim wrapper-side: lane-dense 2-D x DMA, no
    # in-kernel x reshape. Zero-padded columns hit zero rows of W_ih => contribute 0.
    x_flat = jnp.zeros((B * T, PAD_IN), jnp.float32).at[:, :IN].set(
        x_bf.reshape(B * T, IN))
    vmem = pl.BlockSpec(memory_space=pltpu.MemorySpace.VMEM)
    out_pad = pl.pallas_call(
        _net_kernel,
        out_shape=jax.ShapeDtypeStruct((B, LANES), jnp.float32),
        in_specs=[vmem, vmem],          # whole problem resident in VMEM, no grid
        out_specs=vmem,
    )(x_flat, slab)
    return out_pad[:, :OUTPUT_SIZE]


def init_params(key):
    """Deterministic synthetic params, PyTorch-style uniform(-1/sqrt(H), 1/sqrt(H))."""
    k = 1.0 / jnp.sqrt(jnp.float32(HIDDEN))
    keys = jax.random.split(key, 6)
    # Stored transposed relative to PyTorch (so the kernel computes x @ W).
    w_ih = jax.random.uniform(keys[0], (INPUT_SIZE, 4 * HIDDEN), jnp.float32, -k, k)
    w_hh = jax.random.uniform(keys[1], (HIDDEN, 4 * HIDDEN), jnp.float32, -k, k)
    b_ih = jax.random.uniform(keys[2], (4 * HIDDEN,), jnp.float32, -k, k)
    b_hh = jax.random.uniform(keys[3], (4 * HIDDEN,), jnp.float32, -k, k)
    bias = (b_ih + b_hh).reshape(1, 4 * HIDDEN)
    w_out = jax.random.uniform(keys[4], (HIDDEN, OUTPUT_SIZE), jnp.float32, -k, k)
    b_out = jax.random.uniform(keys[5], (OUTPUT_SIZE,), jnp.float32, -k, k).reshape(1, OUTPUT_SIZE)
    return w_ih, w_hh, bias, w_out, b_out


def reference_forward(x_bf, w_ih, w_hh, bias, w_out, b_out):
    """Pure-JAX reference (lax.scan) for correctness checking."""
    B, _, _ = x_bf.shape
    h0 = jnp.zeros((B, HIDDEN), jnp.float32)
    c0 = jnp.zeros((B, HIDDEN), jnp.float32)

    def step(carry, x_t):
        h, c = carry
        gates = x_t @ w_ih + h @ w_hh + bias
        i = jax.nn.sigmoid(gates[:, 0 * HIDDEN:1 * HIDDEN])
        f = jax.nn.sigmoid(gates[:, 1 * HIDDEN:2 * HIDDEN])
        g = jnp.tanh(gates[:, 2 * HIDDEN:3 * HIDDEN])
        o = jax.nn.sigmoid(gates[:, 3 * HIDDEN:4 * HIDDEN])
        c = f * c + i * g
        h = o * jnp.tanh(c)
        return (h, c), None

    (h_last, _), _ = jax.lax.scan(step, (h0, c0), jnp.transpose(x_bf, (1, 0, 2)))
    return h_last @ w_out + b_out


if __name__ == "__main__":
    B, T = 2, 8
    key = jax.random.PRNGKey(0)
    k_x, k_p = jax.random.split(key)
    x = jax.random.normal(k_x, (B, T, INPUT_SIZE), jnp.float32)
    params = init_params(k_p)
    slab = pack_weights(*params)

    y = jax.block_until_ready(net_forward(x, slab))
    y_ref = reference_forward(x, *params)

    assert y.shape == (B, OUTPUT_SIZE)
    max_err = float(jnp.max(jnp.abs(y - y_ref)))
    assert jnp.allclose(y, y_ref, atol=1e-5, rtol=1e-4), (max_err, y, y_ref)
    print("KERNEL_OK")
</pallas_src>

<mosaic_0001>
module attributes {stable_mosaic.version = 11 : i64} {
  func.func @_net_kernel(%arg0: memref<16x128xf32, #tpu.memory_space<vmem>>, %arg1: memref<208x128xf32, #tpu.memory_space<vmem>>, %arg2: memref<2x128xf32, #tpu.memory_space<vmem>>) attributes {dimension_semantics = [], scalar_prefetch = 0 : i64, scratch_operands = 0 : i64, tpu.core_type = #tpu.core_type<tc>} {
    %c0 = arith.constant 0 : index
    %c0_0 = arith.constant 0 : index
    %0 = vector.load %arg1[%c0, %c0_0] : memref<208x128xf32, #tpu.memory_space<vmem>>, vector<128x128xf32>
    %c128 = arith.constant 128 : index
    %c0_1 = arith.constant 0 : index
    %1 = vector.load %arg1[%c128, %c0_1] : memref<208x128xf32, #tpu.memory_space<vmem>>, vector<32x128xf32>
    %c160 = arith.constant 160 : index
    %c0_2 = arith.constant 0 : index
    %2 = vector.load %arg1[%c160, %c0_2] : memref<208x128xf32, #tpu.memory_space<vmem>>, vector<1x128xf32>
    %c168 = arith.constant 168 : index
    %c0_3 = arith.constant 0 : index
    %3 = vector.load %arg1[%c168, %c0_3] : memref<208x128xf32, #tpu.memory_space<vmem>>, vector<32x128xf32>
    %c200 = arith.constant 200 : index
    %c0_4 = arith.constant 0 : index
    %4 = vector.load %arg1[%c200, %c0_4] : memref<208x128xf32, #tpu.memory_space<vmem>>, vector<1x128xf32>
    %c0_5 = arith.constant 0 : index
    %c0_6 = arith.constant 0 : index
    %5 = vector.load %arg0[%c0_5, %c0_6] : memref<16x128xf32, #tpu.memory_space<vmem>>, vector<16x128xf32>
    %cst = arith.constant dense<0.000000e+00> : vector<16x128xf32>
    %6 = tpu.matmul %5, %0, %cst {dimension_numbers = #tpu.dot_dimension_numbers<[1], [0], [0], [1], [0, 0, 1, 1], [], []>} : vector<16x128xf32>, vector<128x128xf32>, vector<16x128xf32> -> vector<16x128xf32>
    %7 = vector.broadcast %2 : vector<1x128xf32> to vector<16x128xf32>
    %8 = arith.addf %6, %7 : vector<16x128xf32>
    %9 = vector.shape_cast %8 : vector<16x128xf32> to vector<2x8x128xf32>
    %cst_7 = arith.constant 0.000000e+00 : f32
    %10 = vector.broadcast %cst_7 : f32 to vector<2x32xf32>
    %cst_8 = arith.constant 0.000000e+00 : f32
    %11 = vector.broadcast %cst_8 : f32 to vector<2x32xf32>
    %12 = vector.extract_strided_slice %9 {offsets = [0, 0, 0], sizes = [2, 1, 128], strides = [1, 1, 1]} : vector<2x8x128xf32> to vector<2x1x128xf32>
    %13 = vector.shape_cast %12 : vector<2x1x128xf32> to vector<2x128xf32>
    %cst_9 = arith.constant dense<0.000000e+00> : vector<2x128xf32>
    %14 = tpu.matmul %10, %1, %cst_9 {dimension_numbers = #tpu.dot_dimension_numbers<[1], [0], [0], [1], [0, 0, 1, 1], [], []>} : vector<2x32xf32>, vector<32x128xf32>, vector<2x128xf32> -> vector<2x128xf32>
    %15 = arith.addf %13, %14 : vector<2x128xf32>
    %16 = arith.negf %15 : vector<2x128xf32>
    %17 = math.exp %16 : vector<2x128xf32>
    %cst_10 = arith.constant 1.000000e+00 : f32
    %18 = vector.broadcast %cst_10 : f32 to vector<2x128xf32>
    %19 = arith.addf %18, %17 : vector<2x128xf32>
    %20 = arith.divf %18, %19 : vector<2x128xf32>
    %21 = math.tanh %15 : vector<2x128xf32>
    %22 = vector.extract_strided_slice %20 {offsets = [0, 0], sizes = [2, 32], strides = [1, 1]} : vector<2x128xf32> to vector<2x32xf32>
    %23 = vector.extract_strided_slice %20 {offsets = [0, 32], sizes = [2, 32], strides = [1, 1]} : vector<2x128xf32> to vector<2x32xf32>
    %24 = vector.extract_strided_slice %21 {offsets = [0, 64], sizes = [2, 32], strides = [1, 1]} : vector<2x128xf32> to vector<2x32xf32>
    %25 = vector.extract_strided_slice %20 {offsets = [0, 96], sizes = [2, 32], strides = [1, 1]} : vector<2x128xf32> to vector<2x32xf32>
    %26 = arith.mulf %23, %11 : vector<2x32xf32>
    %27 = arith.mulf %22, %24 : vector<2x32xf32>
    %28 = arith.addf %26, %27 : vector<2x32xf32>
    %29 = math.tanh %28 : vector<2x32xf32>
    %30 = arith.mulf %25, %29 : vector<2x32xf32>
    %31 = vector.extract_strided_slice %9 {offsets = [0, 1, 0], sizes = [2, 1, 128], strides = [1, 1, 1]} : vector<2x8x128xf32> to vector<2x1x128xf32>
    %32 = vector.shape_cast %31 : vector<2x1x128xf32> to vector<2x128xf32>
    %cst_11 = arith.constant dense<0.000000e+00> : vector<2x128xf32>
    %33 = tpu.matmul %30, %1, %cst_11 {dimension_numbers = #tpu.dot_dimension_numbers<[1], [0], [0], [1], [0, 0, 1, 1], [], []>} : vector<2x32xf32>, vector<32x128xf32>, vector<2x128xf32> -> vector<2x128xf32>
    %34 = arith.addf %32, %33 : vector<2x128xf32>
    %35 = arith.negf %34 : vector<2x128xf32>
    %36 = math.exp %35 : vector<2x128xf32>
    %cst_12 = arith.constant 1.000000e+00 : f32
    %37 = vector.broadcast %cst_12 : f32 to vector<2x128xf32>
    %38 = arith.addf %37, %36 : vector<2x128xf32>
    %39 = arith.divf %37, %38 : vector<2x128xf32>
    %40 = math.tanh %34 : vector<2x128xf32>
    %41 = vector.extract_strided_slice %39 {offsets = [0, 0], sizes = [2, 32], strides = [1, 1]} : vector<2x128xf32> to vector<2x32xf32>
    %42 = vector.extract_strided_slice %39 {offsets = [0, 32], sizes = [2, 32], strides = [1, 1]} : vector<2x128xf32> to vector<2x32xf32>
    %43 = vector.extract_strided_slice %40 {offsets = [0, 64], sizes = [2, 32], strides = [1, 1]} : vector<2x128xf32> to vector<2x32xf32>
    %44 = vector.extract_strided_slice %39 {offsets = [0, 96], sizes = [2, 32], strides = [1, 1]} : vector<2x128xf32> to vector<2x32xf32>
    %45 = arith.mulf %42, %28 : vector<2x32xf32>
    %46 = arith.mulf %41, %43 : vector<2x32xf32>
    %47 = arith.addf %45, %46 : vector<2x32xf32>
    %48 = math.tanh %47 : vector<2x32xf32>
    %49 = arith.mulf %44, %48 : vector<2x32xf32>
    %50 = vector.extract_strided_slice %9 {offsets = [0, 2, 0], sizes = [2, 1, 128], strides = [1, 1, 1]} : vector<2x8x128xf32> to vector<2x1x128xf32>
    %51 = vector.shape_cast %50 : vector<2x1x128xf32> to vector<2x128xf32>
    %cst_13 = arith.constant dense<0.000000e+00> : vector<2x128xf32>
    %52 = tpu.matmul %49, %1, %cst_13 {dimension_numbers = #tpu.dot_dimension_numbers<[1], [0], [0], [1], [0, 0, 1, 1], [], []>} : vector<2x32xf32>, vector<32x128xf32>, vector<2x128xf32> -> vector<2x128xf32>
    %53 = arith.addf %51, %52 : vector<2x128xf32>
    %54 = arith.negf %53 : vector<2x128xf32>
    %55 = math.exp %54 : vector<2x128xf32>
    %cst_14 = arith.constant 1.000000e+00 : f32
    %56 = vector.broadcast %cst_14 : f32 to vector<2x128xf32>
    %57 = arith.addf %56, %55 : vector<2x128xf32>
    %58 = arith.divf %56, %57 : vector<2x128xf32>
    %59 = math.tanh %53 : vector<2x128xf32>
    %60 = vector.extract_strided_slice %58 {offsets = [0, 0], sizes = [2, 32], strides = [1, 1]} : vector<2x128xf32> to vector<2x32xf32>
    %61 = vector.extract_strided_slice %58 {offsets = [0, 32], sizes = [2, 32], strides = [1, 1]} : vector<2x128xf32> to vector<2x32xf32>
    %62 = vector.extract_strided_slice %59 {offsets = [0, 64], sizes = [2, 32], strides = [1, 1]} : vector<2x128xf32> to vector<2x32xf32>
    %63 = vector.extract_strided_slice %58 {offsets = [0, 96], sizes = [2, 32], strides = [1, 1]} : vector<2x128xf32> to vector<2x32xf32>
    %64 = arith.mulf %61, %47 : vector<2x32xf32>
    %65 = arith.mulf %60, %62 : vector<2x32xf32>
    %66 = arith.addf %64, %65 : vector<2x32xf32>
    %67 = math.tanh %66 : vector<2x32xf32>
    %68 = arith.mulf %63, %67 : vector<2x32xf32>
    %69 = vector.extract_strided_slice %9 {offsets = [0, 3, 0], sizes = [2, 1, 128], strides = [1, 1, 1]} : vector<2x8x128xf32> to vector<2x1x128xf32>
    %70 = vector.shape_cast %69 : vector<2x1x128xf32> to vector<2x128xf32>
    %cst_15 = arith.constant dense<0.000000e+00> : vector<2x128xf32>
    %71 = tpu.matmul %68, %1, %cst_15 {dimension_numbers = #tpu.dot_dimension_numbers<[1], [0], [0], [1], [0, 0, 1, 1], [], []>} : vector<2x32xf32>, vector<32x128xf32>, vector<2x128xf32> -> vector<2x128xf32>
    %72 = arith.addf %70, %71 : vector<2x128xf32>
    %73 = arith.negf %72 : vector<2x128xf32>
    %74 = math.exp %73 : vector<2x128xf32>
    %cst_16 = arith.constant 1.000000e+00 : f32
    %75 = vector.broadcast %cst_16 : f32 to vector<2x128xf32>
    %76 = arith.addf %75, %74 : vector<2x128xf32>
    %77 = arith.divf %75, %76 : vector<2x128xf32>
    %78 = math.tanh %72 : vector<2x128xf32>
    %79 = vector.extract_strided_slice %77 {offsets = [0, 0], sizes = [2, 32], strides = [1, 1]} : vector<2x128xf32> to vector<2x32xf32>
    %80 = vector.extract_strided_slice %77 {offsets = [0, 32], sizes = [2, 32], strides = [1, 1]} : vector<2x128xf32> to vector<2x32xf32>
    %81 = vector.extract_strided_slice %78 {offsets = [0, 64], sizes = [2, 32], strides = [1, 1]} : vector<2x128xf32> to vector<2x32xf32>
    %82 = vector.extract_strided_slice %77 {offsets = [0, 96], sizes = [2, 32], strides = [1, 1]} : vector<2x128xf32> to vector<2x32xf32>
    %83 = arith.mulf %80, %66 : vector<2x32xf32>
    %84 = arith.mulf %79, %81 : vector<2x32xf32>
    %85 = arith.addf %83, %84 : vector<2x32xf32>
    %86 = math.tanh %85 : vector<2x32xf32>
    %87 = arith.mulf %82, %86 : vector<2x32xf32>
    %88 = vector.extract_strided_slice %9 {offsets = [0, 4, 0], sizes = [2, 1, 128], strides = [1, 1, 1]} : vector<2x8x128xf32> to vector<2x1x128xf32>
    %89 = vector.shape_cast %88 : vector<2x1x128xf32> to vector<2x128xf32>
    %cst_17 = arith.constant dense<0.000000e+00> : vector<2x128xf32>
    %90 = tpu.matmul %87, %1, %cst_17 {dimension_numbers = #tpu.dot_dimension_numbers<[1], [0], [0], [1], [0, 0, 1, 1], [], []>} : vector<2x32xf32>, vector<32x128xf32>, vector<2x128xf32> -> vector<2x128xf32>
    %91 = arith.addf %89, %90 : vector<2x128xf32>
    %92 = arith.negf %91 : vector<2x128xf32>
    %93 = math.exp %92 : vector<2x128xf32>
    %cst_18 = arith.constant 1.000000e+00 : f32
    %94 = vector.broadcast %cst_18 : f32 to vector<2x128xf32>
    %95 = arith.addf %94, %93 : vector<2x128xf32>
    %96 = arith.divf %94, %95 : vector<2x128xf32>
    %97 = math.tanh %91 : vector<2x128xf32>
    %98 = vector.extract_strided_slice %96 {offsets = [0, 0], sizes = [2, 32], strides = [1, 1]} : vector<2x128xf32> to vector<2x32xf32>
    %99 = vector.extract_strided_slice %96 {offsets = [0, 32], sizes = [2, 32], strides = [1, 1]} : vector<2x128xf32> to vector<2x32xf32>
    %100 = vector.extract_strided_slice %97 {offsets = [0, 64], sizes = [2, 32], strides = [1, 1]} : vector<2x128xf32> to vector<2x32xf32>
    %101 = vector.extract_strided_slice %96 {offsets = [0, 96], sizes = [2, 32], strides = [1, 1]} : vector<2x128xf32> to vector<2x32xf32>
    %102 = arith.mulf %99, %85 : vector<2x32xf32>
    %103 = arith.mulf %98, %100 : vector<2x32xf32>
    %104 = arith.addf %102, %103 : vector<2x32xf32>
    %105 = math.tanh %104 : vector<2x32xf32>
    %106 = arith.mulf %101, %105 : vector<2x32xf32>
    %107 = vector.extract_strided_slice %9 {offsets = [0, 5, 0], sizes = [2, 1, 128], strides = [1, 1, 1]} : vector<2x8x128xf32> to vector<2x1x128xf32>
    %108 = vector.shape_cast %107 : vector<2x1x128xf32> to vector<2x128xf32>
    %cst_19 = arith.constant dense<0.000000e+00> : vector<2x128xf32>
    %109 = tpu.matmul %106, %1, %cst_19 {dimension_numbers = #tpu.dot_dimension_numbers<[1], [0], [0], [1], [0, 0, 1, 1], [], []>} : vector<2x32xf32>, vector<32x128xf32>, vector<2x128xf32> -> vector<2x128xf32>
    %110 = arith.addf %108, %109 : vector<2x128xf32>
    %111 = arith.negf %110 : vector<2x128xf32>
    %112 = math.exp %111 : vector<2x128xf32>
    %cst_20 = arith.constant 1.000000e+00 : f32
    %113 = vector.broadcast %cst_20 : f32 to vector<2x128xf32>
    %114 = arith.addf %113, %112 : vector<2x128xf32>
    %115 = arith.divf %113, %114 : vector<2x128xf32>
    %116 = math.tanh %110 : vector<2x128xf32>
    %117 = vector.extract_strided_slice %115 {offsets = [0, 0], sizes = [2, 32], strides = [1, 1]} : vector<2x128xf32> to vector<2x32xf32>
    %118 = vector.extract_strided_slice %115 {offsets = [0, 32], sizes = [2, 32], strides = [1, 1]} : vector<2x128xf32> to vector<2x32xf32>
    %119 = vector.extract_strided_slice %116 {offsets = [0, 64], sizes = [2, 32], strides = [1, 1]} : vector<2x128xf32> to vector<2x32xf32>
    %120 = vector.extract_strided_slice %115 {offsets = [0, 96], sizes = [2, 32], strides = [1, 1]} : vector<2x128xf32> to vector<2x32xf32>
    %121 = arith.mulf %118, %104 : vector<2x32xf32>
    %122 = arith.mulf %117, %119 : vector<2x32xf32>
    %123 = arith.addf %121, %122 : vector<2x32xf32>
    %124 = math.tanh %123 : vector<2x32xf32>
    %125 = arith.mulf %120, %124 : vector<2x32xf32>
    %126 = vector.extract_strided_slice %9 {offsets = [0, 6, 0], sizes = [2, 1, 128], strides = [1, 1, 1]} : vector<2x8x128xf32> to vector<2x1x128xf32>
    %127 = vector.shape_cast %126 : vector<2x1x128xf32> to vector<2x128xf32>
    %cst_21 = arith.constant dense<0.000000e+00> : vector<2x128xf32>
    %128 = tpu.matmul %125, %1, %cst_21 {dimension_numbers = #tpu.dot_dimension_numbers<[1], [0], [0], [1], [0, 0, 1, 1], [], []>} : vector<2x32xf32>, vector<32x128xf32>, vector<2x128xf32> -> vector<2x128xf32>
    %129 = arith.addf %127, %128 : vector<2x128xf32>
    %130 = arith.negf %129 : vector<2x128xf32>
    %131 = math.exp %130 : vector<2x128xf32>
    %cst_22 = arith.constant 1.000000e+00 : f32
    %132 = vector.broadcast %cst_22 : f32 to vector<2x128xf32>
    %133 = arith.addf %132, %131 : vector<2x128xf32>
    %134 = arith.divf %132, %133 : vector<2x128xf32>
    %135 = math.tanh %129 : vector<2x128xf32>
    %136 = vector.extract_strided_slice %134 {offsets = [0, 0], sizes = [2, 32], strides = [1, 1]} : vector<2x128xf32> to vector<2x32xf32>
    %137 = vector.extract_strided_slice %134 {offsets = [0, 32], sizes = [2, 32], strides = [1, 1]} : vector<2x128xf32> to vector<2x32xf32>
    %138 = vector.extract_strided_slice %135 {offsets = [0, 64], sizes = [2, 32], strides = [1, 1]} : vector<2x128xf32> to vector<2x32xf32>
    %139 = vector.extract_strided_slice %134 {offsets = [0, 96], sizes = [2, 32], strides = [1, 1]} : vector<2x128xf32> to vector<2x32xf32>
    %140 = arith.mulf %137, %123 : vector<2x32xf32>
    %141 = arith.mulf %136, %138 : vector<2x32xf32>
    %142 = arith.addf %140, %141 : vector<2x32xf32>
    %143 = math.tanh %142 : vector<2x32xf32>
    %144 = arith.mulf %139, %143 : vector<2x32xf32>
    %145 = vector.extract_strided_slice %9 {offsets = [0, 7, 0], sizes = [2, 1, 128], strides = [1, 1, 1]} : vector<2x8x128xf32> to vector<2x1x128xf32>
    %146 = vector.shape_cast %145 : vector<2x1x128xf32> to vector<2x128xf32>
    %cst_23 = arith.constant dense<0.000000e+00> : vector<2x128xf32>
    %147 = tpu.matmul %144, %1, %cst_23 {dimension_numbers = #tpu.dot_dimension_numbers<[1], [0], [0], [1], [0, 0, 1, 1], [], []>} : vector<2x32xf32>, vector<32x128xf32>, vector<2x128xf32> -> vector<2x128xf32>
    %148 = arith.addf %146, %147 : vector<2x128xf32>
    %149 = arith.negf %148 : vector<2x128xf32>
    %150 = math.exp %149 : vector<2x128xf32>
    %cst_24 = arith.constant 1.000000e+00 : f32
    %151 = vector.broadcast %cst_24 : f32 to vector<2x128xf32>
    %152 = arith.addf %151, %150 : vector<2x128xf32>
    %153 = arith.divf %151, %152 : vector<2x128xf32>
    %154 = math.tanh %148 : vector<2x128xf32>
    %155 = vector.extract_strided_slice %153 {offsets = [0, 0], sizes = [2, 32], strides = [1, 1]} : vector<2x128xf32> to vector<2x32xf32>
    %156 = vector.extract_strided_slice %153 {offsets = [0, 32], sizes = [2, 32], strides = [1, 1]} : vector<2x128xf32> to vector<2x32xf32>
    %157 = vector.extract_strided_slice %154 {offsets = [0, 64], sizes = [2, 32], strides = [1, 1]} : vector<2x128xf32> to vector<2x32xf32>
    %158 = vector.extract_strided_slice %153 {offsets = [0, 96], sizes = [2, 32], strides = [1, 1]} : vector<2x128xf32> to vector<2x32xf32>
    %159 = arith.mulf %156, %142 : vector<2x32xf32>
    %160 = arith.mulf %155, %157 : vector<2x32xf32>
    %161 = arith.addf %159, %160 : vector<2x32xf32>
    %162 = math.tanh %161 : vector<2x32xf32>
    %163 = arith.mulf %158, %162 : vector<2x32xf32>
    %cst_25 = arith.constant dense<0.000000e+00> : vector<2x128xf32>
    %164 = tpu.matmul %163, %3, %cst_25 {dimension_numbers = #tpu.dot_dimension_numbers<[1], [0], [0], [1], [0, 0, 1, 1], [], []>} : vector<2x32xf32>, vector<32x128xf32>, vector<2x128xf32> -> vector<2x128xf32>
    %165 = vector.broadcast %4 : vector<1x128xf32> to vector<2x128xf32>
    %166 = arith.addf %164, %165 : vector<2x128xf32>
    %c0_26 = arith.constant 0 : index
    %c0_27 = arith.constant 0 : index
    %167 = vector.load %arg2[%c0_26, %c0_27] : memref<2x128xf32, #tpu.memory_space<vmem>>, vector<2x128xf32>
    tpu.vector_store %arg2[%c0_26, %c0_27], %166 {strides = array<i32>} : memref<2x128xf32, #tpu.memory_space<vmem>>, vector<2x128xf32>,
    return
  }
}

</mosaic_0001>

<bundles_post_ra>
// kernel: net_forward.1
= control target key start
LH: loop header
LB: loop body
LE: loop exit
PB: predicated region body
PF: predicated region fallthrough
CT: control target
= control target key end

     0   :  { %7 = vsyncpa [#allocation3], 0  ;;  %s1477_s0 = inlined_call_operand.vmem [shape: f32[16,128], index: 0, kind: input, shape index: {}]   ;;  %s1478_s1 = inlined_call_operand.hbm [shape: f32[208,128], index: 1, kind: input, shape index: {}]   ;;  %s1479_s2 = inlined_call_operand.hbm [shape: f32[2,128], index: 2, kind: output, shape index: {}]  }
   0x1   :  { %8 = vsyncpa [#allocation4], 0  ;;  %s15_s11 = sshll.u32 %s1478_s1, 4  ;;  %s1255_s12 = smov [#allocation2]   ;;  %s16_s11 = int_to_ptr.hbm [resolvable:$true] %s15_s11 }
   0x2   :  { %s17_s13 = sshll.u32 %s1255_s12, 4  ;;  %s1256_s14 = smov 128   ;;  %s18_s13 = int_to_ptr.vmem [resolvable:$true] %s17_s13 }
   0x3   :  { %s1257_s15 = smov 8  }
   0x4   :  { %23 = dma.hbm_to_vmem [thread:$0]  %s16_s11, 3328, %s18_s13, [#allocation3], %s1256_s14, %s1256_s14, %s1257_s15  }
   0x5   :  { %1251 = dma.done.wait [#allocation3], 3328  }
   0x6   :  { %1252 = vsyncadd [#allocation3], 4294963968  ;;  %v43_v0 = vld [vmem:[#allocation2 + $0x78] sm:$0xff]  ;;  %v42_v1 = vld [vmem:[#allocation2 + $0x70] sm:$0xff]  ;;  %v1258_v12 = vmov 0.0   ;;  %s1259_s19 = smov 64  }
   0x7   :  { %57 = vmatpush.msra.mxu0 %v43_v0  ;;  %v41_v2 = vld [vmem:[#allocation2 + $0x68] sm:$0xff]  ;;  %v40_v3 = vld [vmem:[#allocation2 + $0x60] sm:$0xff]  ;;  %v1280_v4 = vld [vmem:[#allocation2 + $0x98] sm:$0xff]  ;;  %vm187_vm8 = vcmask 1041409   ;;  %vm80_vm9 = vcmask 261120   ;;  %s1261_s20 = smov [#allocation5]  }
   0x8   :  { %96 = vmatpush.msra.mxu1 %v1280_v4  ;;  %v1283_v5 = vld [vmem:[#allocation2 + $0x90] sm:$0xff]  ;;  %v39_v6 = vld [vmem:[#allocation2 + $0x58] sm:$0xff]  ;;  %v1285_v7 = vld [vmem:[#allocation2 + $0x88] sm:$0xff]  ;;  %205 = vmatpush.msra.mxu2 %v1280_v4  ;;  %s1030_s21 = sshll.u32 %s1261_s20, 4  ;;  %s1032_s24 = sshll.u32 %s1479_s2, 4  ;;  %s1031_s21 = int_to_ptr.vmem [resolvable:$true] %s1030_s21  ;;  %s1033_s24 = int_to_ptr.hbm [resolvable:$true] %s1032_s24 }
   0x9   :  { %58 = vmatpush.msra.mxu0 %v42_v1  ;;  %319 = vmatpush.msra.mxu3 %v1280_v4  ;;  %v38_v8 = vld [vmem:[#allocation2 + $0x50] sm:$0xff]  ;;  %v1290_v9 = vld [vmem:[#allocation2 + $0x80] sm:$0xff]  ;;  %v37_v10 = vld [vmem:[#allocation2 + $0x48] sm:$0xff] }
   0xa   :  { %97 = vmatpush.msra.mxu1 %v1283_v5  ;;  %206 = vmatpush.msra.mxu2 %v1283_v5  ;;  %v36_v11 = vld [vmem:[#allocation2 + $0x40] sm:$0xff]  ;;  %v35_v13 = vld [vmem:[#allocation2 + $0x38] sm:$0xff]  ;;  %v34_v14 = vld [vmem:[#allocation2 + $0x30] sm:$0xff] }
   0xb   :  { %59 = vmatpush.msra.mxu0 %v41_v2  ;;  %320 = vmatpush.msra.mxu3 %v1283_v5  ;;  %v33_v15 = vld [vmem:[#allocation2 + $0x28] sm:$0xff]  ;;  %v32_v16 = vld [vmem:[#allocation2 + $0x20] sm:$0xff]  ;;  %v31_v17 = vld [vmem:[#allocation2 + $0x18] sm:$0xff] }
   0xc   :  { %98 = vmatpush.msra.mxu1 %v1285_v7  ;;  %207 = vmatpush.msra.mxu2 %v1285_v7  ;;  %v30_v18 = vld [vmem:[#allocation2 + $0x10] sm:$0xff]  ;;  %v29_v19 = vld [vmem:[#allocation2 + $0x8] sm:$0xff]  ;;  %v28_v20 = vld [vmem:[#allocation2] sm:$0xff] }
   0xd   :  { %60 = vmatpush.msra.mxu0 %v40_v3  ;;  %321 = vmatpush.msra.mxu3 %v1285_v7  ;;  %v54_v21 = vld [vmem:[%s1477_s0] sm:$0xff]  ;;  %v55_v22 = vld [vmem:[%s1477_s0 + $0x8] sm:$0xff]  ;;  %s1260_s0 = smov 32  }
   0xe   :  { %99 = vmatpush.msra.mxu1 %v1290_v9  ;;  %208 = vmatpush.msra.mxu2 %v1290_v9  ;;  %v1073_v25 = vld [vmem:[#allocation2 + $0xa0] ss:$0 sm:$0xff] }
   0xf   :  { %61 = vmatpush.msra.mxu0 %v39_v6  ;;  %100 = vmatmul.f32.vlgmr.msra.gmra.mxu1 %v1258_v12 }
  0x10   :  { %322 = vmatpush.msra.mxu3 %v1290_v9  ;;  %435 = vmatpush.msrb.mxu1 %v1280_v4 }
  0x11   :  { %62 = vmatpush.msra.mxu0 %v38_v8  ;;  %551 = vmatpush.msrb.mxu2 %v1280_v4 }
  0x12   :  { %667 = vmatpush.msrb.mxu3 %v1280_v4  ;;  %436 = vmatpush.msrb.mxu1 %v1283_v5 }
  0x13   :  { %63 = vmatpush.msra.mxu0 %v37_v10  ;;  %552 = vmatpush.msrb.mxu2 %v1283_v5 }
  0x14   :  { %668 = vmatpush.msrb.mxu3 %v1283_v5  ;;  %437 = vmatpush.msrb.mxu1 %v1285_v7 }
  0x15   :  { %64 = vmatpush.msra.mxu0 %v36_v11  ;;  %553 = vmatpush.msrb.mxu2 %v1285_v7 }
  0x16   :  { %669 = vmatpush.msrb.mxu3 %v1285_v7  ;;  %438 = vmatpush.msrb.mxu1 %v1290_v9 }
  0x17   :  { %65 = vmatpush.msra.mxu0 %v35_v13  ;;  %554 = vmatpush.msrb.mxu2 %v1290_v9 }
  0x18   :  { %670 = vmatpush.msrb.mxu3 %v1290_v9  ;;  %783 = vmatpush.msra.mxu1 %v1280_v4 }
  0x19   :  { %66 = vmatpush.msra.mxu0 %v34_v14 }
  0x1a   :  { %784 = vmatpush.msra.mxu1 %v1283_v5 }
  0x1b   :  { %67 = vmatpush.msra.mxu0 %v33_v15 }
  0x1c   :  { %785 = vmatpush.msra.mxu1 %v1285_v7 }
  0x1d   :  { %68 = vmatpush.msra.mxu0 %v32_v16 }
  0x1e   :  { %786 = vmatpush.msra.mxu1 %v1290_v9 }
  0x1f   :  { %69 = vmatpush.msra.mxu0 %v31_v17 }
  0x21   :  { %70 = vmatpush.msra.mxu0 %v30_v18 }
  0x23   :  { %71 = vmatpush.msra.mxu0 %v29_v19 }
  0x25   :  { %72 = vmatpush.msra.mxu0 %v28_v20 }
  0x26   :  { %73 = vmatmul.f32.vlgmr.msra.gmra.mxu0 %v54_v21 }
  0x2e   :  { %76 = vmatmul.f32.gmra.mxu0 %v55_v22 }
  0x8c   :  { %v101_v24 = vpop.f32.mrf.mxu1 }
  0x8d   :  { %v105_v26 = vrot.slane %v101_v24, 1 }
  0xa3   :  { %v74_v23 = vpop.f32.mrf.mxu0 }
  0xa4   :  { %v1325_v30 = vadd.f32 %v1073_v25, %v74_v23 }
  0xa6   :  { %v108_v31 = vadd.f32 %v101_v24, %v1325_v30 }
  0xa8   :  { %v1042_v35 = vmul.f32 -1.442695, %v108_v31 }
  0xab   :  { %v77_v27 = vpop.f32.mrf.mxu0 }
  0xac   :  { %v1322_v28 = vadd.f32 %v1073_v25, %v77_v27 }
  0xae   :  { %v109_v29 = vadd.f32 %v105_v26, %v1322_v28 }
  0xb0   :  { %1075 = vtanh.f32 %v109_v29  ;;  %v1043_v34 = vmul.f32 -1.442695, %v109_v29 }
  0xb1   :  { %1077 = vtanh.f32 %v108_v31 }
  0xb2   :  { %1079 = vpow2.f32 %v1043_v34 }
  0xb3   :  { %1081 = vpow2.f32 %v1042_v35 }
  0xb6   :  { %v1076_v32 = vpop.eup %1075 }
  0xb7   :  { %156 = vrot.lane.b32.xlu0 %v1076_v32, %s1259_s19  ;;  %v1078_v33 = vpop.eup %1077 }
  0xb8   :  { %v1080_v36 = vpop.eup %1079 }
  0xb9   :  { %v117_v37 = vadd.f32 1.0, %v1080_v36  ;;  %v1082_v38 = vpop.eup %1081 }
  0xba   :  { %v116_v39 = vadd.f32 1.0, %v1082_v38 }
  0xbb   :  { %1083 = vrcp.f32 %v117_v37  ;;  %v144_v48 = vand.u32 2147483648, %v117_v37  ;;  %vm138_vm1 = vweird.f32 %v117_v37  ;;  %v142_v49 = vand.u32 2147483647, %v117_v37 }
  0xbc   :  { %1085 = vrcp.f32 %v116_v39  ;;  %v129_v57 = vand.u32 2147483648, %v116_v39  ;;  %vm123_vm5 = vweird.f32 %v116_v39  ;;  %v127_v58 = vand.u32 2147483647, %v116_v39 }
  0xbd   :  { %v145_v52 = vor.u32 1.1754944e-38, %v144_v48  ;;  %vm143_vm3 = vcmp.eq.f32.partialorder %v142_v49, 8.507059e+37 }
  0xbe   :  { %v130_v60 = vor.u32 1.1754944e-38, %v129_v57  ;;  %vm128_vm7 = vcmp.eq.f32.partialorder %v127_v58, 8.507059e+37 }
  0xbf   :  { %154 = vrot.lane.b32.xlu0 %v1078_v33, %s1259_s19 }
  0xc1   :  { %v1084_v40 = vpop.eup %1083 }
  0xc2   :  { %v134_v41 = vmul.f32 %v1084_v40, %v117_v37  ;;  %v1086_v43 = vpop.eup %1085  ;;  %vm139_vm0 = vweird.f32 %v1084_v40 }
  0xc3   :  { %v119_v45 = vmul.f32 %v1086_v43, %v116_v39  ;;  %vm140_vm2 = vmor %vm138_vm1, %vm139_vm0  ;;  %vm124_vm4 = vweird.f32 %v1086_v43 }
  0xc4   :  { %v135_v42 = vsub.f32 1.0, %v134_v41  ;;  %vm125_vm6 = vmor %vm123_vm5, %vm124_vm4 }
  0xc5   :  { %v120_v47 = vsub.f32 1.0, %v119_v45 }
  0xc6   :  { %v136_v44 = vmul.f32 %v1084_v40, %v135_v42 }
  0xc7   :  { %v121_v51 = vmul.f32 %v1086_v43, %v120_v47 }
  0xc8   :  { %v137_v46 = vadd.f32 %v1084_v40, %v136_v44 }
  0xc9   :  { %v122_v56 = vadd.f32 %v1086_v43, %v121_v51 }
  0xca   :  { %v141_v50 = vsel %vm140_vm2, %v1084_v40, %v137_v46 }
  0xcb   :  { %v146_v54 = vsel %vm143_vm3, %v145_v52, %v141_v50  ;;  %v126_v59 = vsel %vm125_vm6, %v1086_v43, %v122_v56 }
  0xcc   :  { %v131_v62 = vsel %vm128_vm7, %v130_v60, %v126_v59  ;;  %v151_v0 = vmul.f32 0.0, %v146_v54 }
  0xcd   :  { %v150_v3 = vmul.f32 0.0, %v131_v62 }
 0x129   :  { %v157_v53 = vpop.permute.xlu0 %156 }
 0x12a   :  { %v161_v55 = vmul.f32 %v157_v53, %v146_v54 }
 0x12c   :  { %166 = vrot.lane.b32.xlu1 %v161_v55, %s1260_s0 }
 0x131   :  { %v155_v61 = vpop.permute.xlu0 %154 }
 0x132   :  { %v160_v63 = vmul.f32 %v155_v61, %v131_v62 }
 0x134   :  { %164 = vrot.lane.b32.xlu1 %v160_v63, %s1260_s0 }
 0x19e   :  { %v167_v1 = vpop.permute.xlu1 %166 }
 0x19f   :  { %v1332_v2 = vadd.f32 %v167_v1, %v151_v0 }
 0x1a1   :  { %1087 = vtanh.f32 %v1332_v2  ;;  %v262_v53 = vrot.slane %v1332_v2, 7 }
 0x1a6   :  { %v165_v6 = vpop.permute.xlu1 %164 }
 0x1a7   :  { %v1088_v8 = vpop.eup %1087  ;;  %v1335_v10 = vadd.f32 %v165_v6, %v150_v3 }
 0x1a8   :  { %178 = vrot.lane.b32.xlu2 %v1088_v8, %s1259_s19 }
 0x1a9   :  { %1089 = vtanh.f32 %v1335_v10  ;;  %v261_v58 = vrot.slane %v1335_v10, 7 }
 0x1af   :  { %v1090_v11 = vpop.eup %1089 }
 0x1b0   :  { %176 = vrot.lane.b32.xlu2 %v1090_v11, %s1259_s19 }
 0x202   :  { %v179_v12 = vpop.permute.xlu2 %178 }
 0x203   :  { %v183_v13 = vmul.f32 %v179_v12, %v146_v54 }
 0x205   :  { %v186_v15 = vrot.slane %v183_v13, 7 }
 0x20a   :  { %v177_v14 = vpop.permute.xlu2 %176 }
 0x20b   :  { %v182_v16 = vmul.f32 %v177_v14, %v131_v62 }
 0x20d   :  { %v188_v17 = vsel %vm187_vm8, %v186_v15, %v182_v16 }
 0x20e   :  { %189 = vrot.lane.b32.xlu0 %v188_v17, %s1260_s0 }
 0x280   :  { %v190_v18 = vpop.permute.xlu0 %189 }
 0x281   :  { %1044 = vmatmul.msk.f32.vlgmr.msra.gmra.mxu2 %vm80_vm9, %v190_v18 }
 0x282   :  { %899 = vmatpush.msra.mxu2 %v1280_v4 }
 0x284   :  { %900 = vmatpush.msra.mxu2 %v1283_v5 }
 0x286   :  { %901 = vmatpush.msra.mxu2 %v1285_v7 }
 0x288   :  { %902 = vmatpush.msra.mxu2 %v1290_v9 }
 0x304   :  { %v210_v19 = vpop.f32.mrf.mxu2 }
 0x305   :  { %v214_v20 = vrot.slane %v210_v19, 7  ;;  %v218_v21 = vadd.f32 %v210_v19, %v1322_v28 }
 0x307   :  { %v217_v22 = vadd.f32 %v214_v20, %v1325_v30  ;;  %1091 = vtanh.f32 %v218_v21  ;;  %v1046_v4 = vmul.f32 -1.442695, %v218_v21 }
 0x309   :  { %1093 = vtanh.f32 %v217_v22  ;;  %v1045_v26 = vmul.f32 -1.442695, %v217_v22 }
 0x30a   :  { %1095 = vpow2.f32 %v1046_v4 }
 0x30d   :  { %v1092_v23 = vpop.eup %1091 }
 0x30e   :  { %271 = vrot.lane.b32.xlu2 %v1092_v23, %s1259_s19 }
 0x30f   :  { %v1094_v24 = vpop.eup %1093 }
 0x310   :  { %269 = vrot.lane.b32.xlu1 %v1094_v24, %s1259_s19  ;;  %v1096_v5 = vpop.eup %1095 }
 0x311   :  { %v226_v7 = vadd.f32 1.0, %v1096_v5 }
 0x313   :  { %1097 = vrcp.f32 %v226_v7  ;;  %v253_v33 = vand.u32 2147483648, %v226_v7  ;;  %vm247_vm11 = vweird.f32 %v226_v7  ;;  %v251_v35 = vand.u32 2147483647, %v226_v7 }
 0x314   :  { %1099 = vpow2.f32 %v1045_v26 }
 0x315   :  { %v254_v37 = vor.u32 1.1754944e-38, %v253_v33  ;;  %vm252_vm13 = vcmp.eq.f32.partialorder %v251_v35, 8.507059e+37 }
 0x319   :  { %v1098_v9 = vpop.eup %1097 }
 0x31a   :  { %v243_v25 = vmul.f32 %v1098_v9, %v226_v7  ;;  %v1100_v31 = vpop.eup %1099  ;;  %vm248_vm10 = vweird.f32 %v1098_v9 }
 0x31b   :  { %v225_v34 = vadd.f32 1.0, %v1100_v31  ;;  %vm249_vm12 = vmor %vm247_vm11, %vm248_vm10 }
 0x31c   :  { %v244_v27 = vsub.f32 1.0, %v243_v25 }
 0x31d   :  { %1101 = vrcp.f32 %v225_v34  ;;  %v238_v46 = vand.u32 2147483648, %v225_v34  ;;  %vm232_vm15 = vweird.f32 %v225_v34  ;;  %v236_v47 = vand.u32 2147483647, %v225_v34 }
 0x31e   :  { %v245_v29 = vmul.f32 %v1098_v9, %v244_v27 }
 0x31f   :  { %v239_v49 = vor.u32 1.1754944e-38, %v238_v46  ;;  %vm237_vm1 = vcmp.eq.f32.partialorder %v236_v47, 8.507059e+37 }
 0x320   :  { %v246_v32 = vadd.f32 %v1098_v9, %v245_v29 }
 0x322   :  { %v250_v36 = vsel %vm249_vm12, %v1098_v9, %v246_v32 }
 0x323   :  { %v255_v39 = vsel %vm252_vm13, %v254_v37, %v250_v36  ;;  %v1102_v41 = vpop.eup %1101 }
 0x324   :  { %v228_v42 = vmul.f32 %v1102_v41, %v225_v34  ;;  %vm233_vm14 = vweird.f32 %v1102_v41  ;;  %v266_v54 = vmul.f32 %v262_v53, %v255_v39 }
 0x325   :  { %vm234_vm0 = vmor %vm232_vm15, %vm233_vm14 }
 0x326   :  { %v229_v43 = vsub.f32 1.0, %v228_v42 }
 0x328   :  { %v230_v44 = vmul.f32 %v1102_v41, %v229_v43 }
 0x32a   :  { %v231_v45 = vadd.f32 %v1102_v41, %v230_v44 }
 0x32c   :  { %v235_v48 = vsel %vm234_vm0, %v1102_v41, %v231_v45 }
 0x32d   :  { %v240_v51 = vsel %vm237_vm1, %v239_v49, %v235_v48 }
 0x32e   :  { %v265_v59 = vmul.f32 %v261_v58, %v240_v51 }
 0x368   :  { %v272_v38 = vpop.permute.xlu2 %271 }
 0x369   :  { %v276_v40 = vmul.f32 %v272_v38, %v255_v39 }
 0x36b   :  { %281 = vrot.lane.b32.xlu1 %v276_v40, %s1260_s0 }
 0x382   :  { %v270_v50 = vpop.permute.xlu1 %269 }
 0x383   :  { %v275_v52 = vmul.f32 %v270_v50, %v240_v51 }
 0x385   :  { %279 = vrot.lane.b32.xlu0 %v275_v52, %s1260_s0 }
 0x3dd   :  { %v282_v55 = vpop.permute.xlu1 %281 }
 0x3de   :  { %v1354_v56 = vadd.f32 %v282_v55, %v266_v54 }
 0x3e0   :  { %1103 = vtanh.f32 %v1354_v56  ;;  %v377_v46 = vrot.slane %v1354_v56, 7 }
 0x3e6   :  { %v1104_v57 = vpop.eup %1103 }
 0x3e7   :  { %293 = vrot.lane.b32.xlu0 %v1104_v57, %s1259_s19 }
 0x3f7   :  { %v280_v60 = vpop.permute.xlu0 %279 }
 0x3f8   :  { %v1359_v61 = vadd.f32 %v280_v60, %v265_v59 }
 0x3fa   :  { %1105 = vtanh.f32 %v1359_v61  ;;  %v376_v45 = vrot.slane %v1359_v61, 7 }
 0x400   :  { %v1106_v62 = vpop.eup %1105 }
 0x401   :  { %291 = vrot.lane.b32.xlu2 %v1106_v62, %s1259_s19 }
 0x459   :  { %v294_v63 = vpop.permute.xlu0 %293 }
 0x45a   :  { %v298_v2 = vmul.f32 %v294_v63, %v255_v39 }
 0x45b   :  { %v292_v0 = vpop.permute.xlu2 %291 }
 0x45c   :  { %v297_v1 = vmul.f32 %v292_v0, %v240_v51 }
 0x45e   :  { %v301_v3 = vrot.slane %v297_v1, 1 }
 0x460   :  { %v302_v6 = vsel %vm187_vm8, %v298_v2, %v301_v3 }
 0x461   :  { %303 = vrot.lane.b32.xlu1 %v302_v6, %s1260_s0 }
 0x4d3   :  { %v304_v8 = vpop.permute.xlu1 %303 }
 0x4d4   :  { %1047 = vmatmul.msk.f32.vlgmr.msra.gmra.mxu3 %vm80_vm9, %v304_v8 }
 0x557   :  { %v324_v10 = vpop.f32.mrf.mxu3 }
 0x558   :  { %v328_v11 = vrot.slane %v324_v10, 6  ;;  %v329_v12 = vrot.slane %v324_v10, 7 }
 0x55a   :  { %v332_v13 = vadd.f32 %v328_v11, %v1325_v30  ;;  %v333_v14 = vadd.f32 %v329_v12, %v1322_v28 }
 0x55c   :  { %1107 = vtanh.f32 %v332_v13  ;;  %v1048_v17 = vmul.f32 -1.442695, %v332_v13  ;;  %v1049_v21 = vmul.f32 -1.442695, %v333_v14 }
 0x55d   :  { %1109 = vtanh.f32 %v333_v14 }
 0x55e   :  { %1111 = vpow2.f32 %v1048_v17 }
 0x562   :  { %v1108_v15 = vpop.eup %1107 }
 0x563   :  { %v1110_v16 = vpop.eup %1109  ;;  %384 = vrot.lane.b32.xlu2 %v1108_v15, %s1259_s19 }
 0x564   :  { %386 = vrot.lane.b32.xlu0 %v1110_v16, %s1259_s19  ;;  %v1112_v18 = vpop.eup %1111 }
 0x565   :  { %v340_v19 = vadd.f32 1.0, %v1112_v18 }
 0x567   :  { %1113 = vrcp.f32 %v340_v19  ;;  %v353_v9 = vand.u32 2147483648, %v340_v19  ;;  %vm347_vm3 = vweird.f32 %v340_v19  ;;  %v351_v25 = vand.u32 2147483647, %v340_v19 }
 0x568   :  { %1115 = vpow2.f32 %v1049_v21 }
 0x569   :  { %v354_v27 = vor.u32 1.1754944e-38, %v353_v9  ;;  %vm352_vm5 = vcmp.eq.f32.partialorder %v351_v25, 8.507059e+37 }
 0x56d   :  { %v1114_v20 = vpop.eup %1113 }
 0x56e   :  { %v343_v22 = vmul.f32 %v1114_v20, %v340_v19  ;;  %v1116_v4 = vpop.eup %1115  ;;  %vm348_vm2 = vweird.f32 %v1114_v20 }
 0x56f   :  { %v341_v5 = vadd.f32 1.0, %v1116_v4  ;;  %vm349_vm4 = vmor %vm347_vm3, %vm348_vm2 }
 0x570   :  { %v344_v23 = vsub.f32 1.0, %v343_v22 }
 0x571   :  { %1117 = vrcp.f32 %v341_v5  ;;  %v368_v38 = vand.u32 2147483648, %v341_v5  ;;  %vm362_vm7 = vweird.f32 %v341_v5  ;;  %v366_v39 = vand.u32 2147483647, %v341_v5 }
 0x572   :  { %v345_v24 = vmul.f32 %v1114_v20, %v344_v23 }
 0x573   :  { %v369_v41 = vor.u32 1.1754944e-38, %v368_v38  ;;  %vm367_vm11 = vcmp.eq.f32.partialorder %v366_v39, 8.507059e+37 }
 0x574   :  { %v346_v7 = vadd.f32 %v1114_v20, %v345_v24 }
 0x576   :  { %v350_v26 = vsel %vm349_vm4, %v1114_v20, %v346_v7 }
 0x577   :  { %v355_v31 = vsel %vm352_vm5, %v354_v27, %v350_v26  ;;  %v1118_v33 = vpop.eup %1117 }
 0x578   :  { %v358_v34 = vmul.f32 %v1118_v33, %v341_v5  ;;  %vm363_vm6 = vweird.f32 %v1118_v33  ;;  %v380_v47 = vmul.f32 %v376_v45, %v355_v31 }
 0x579   :  { %vm364_vm10 = vmor %vm362_vm7, %vm363_vm6 }
 0x57a   :  { %v359_v35 = vsub.f32 1.0, %v358_v34 }
 0x57c   :  { %v360_v36 = vmul.f32 %v1118_v33, %v359_v35 }
 0x57e   :  { %v361_v37 = vadd.f32 %v1118_v33, %v360_v36 }
 0x580   :  { %v365_v40 = vsel %vm364_vm10, %v1118_v33, %v361_v37 }
 0x581   :  { %v370_v43 = vsel %vm367_vm11, %v369_v41, %v365_v40 }
 0x582   :  { %v381_v48 = vmul.f32 %v377_v46, %v370_v43 }
 0x5bd   :  { %v385_v29 = vpop.permute.xlu2 %384 }
 0x5be   :  { %v390_v32 = vmul.f32 %v385_v29, %v355_v31 }
 0x5c0   :  { %394 = vrot.lane.b32.xlu1 %v390_v32, %s1260_s0 }
 0x5d6   :  { %v387_v42 = vpop.permute.xlu0 %386 }
 0x5d7   :  { %v391_v44 = vmul.f32 %v387_v42, %v370_v43 }
 0x5d9   :  { %396 = vrot.lane.b32.xlu2 %v391_v44, %s1260_s0 }
 0x632   :  { %v395_v49 = vpop.permute.xlu1 %394 }
 0x633   :  { %v397_v50 = vpop.permute.xlu2 %396  ;;  %v1374_v51 = vadd.f32 %v395_v49, %v380_v47 }
 0x634   :  { %v1376_v52 = vadd.f32 %v397_v50, %v381_v48 }
 0x635   :  { %1119 = vtanh.f32 %v1374_v51  ;;  %v492_v38 = vrot.slane %v1374_v51, 7 }
 0x636   :  { %1121 = vtanh.f32 %v1376_v52 }
 0x63b   :  { %v1120_v53 = vpop.eup %1119 }
 0x63c   :  { %v1122_v54 = vpop.eup %1121  ;;  %406 = vrot.lane.b32.xlu0 %v1120_v53, %s1259_s19 }
 0x63d   :  { %408 = vrot.lane.b32.xlu1 %v1122_v54, %s1259_s19 }
 0x6ae   :  { %v407_v55 = vpop.permute.xlu0 %406 }
 0x6af   :  { %v409_v56 = vpop.permute.xlu1 %408  ;;  %v412_v57 = vmul.f32 %v407_v55, %v355_v31 }
 0x6b0   :  { %v413_v58 = vmul.f32 %v409_v56, %v370_v43  ;;  %v493_v43 = vrot.slane %v1376_v52, 7 }
 0x6b1   :  { %v416_v59 = vrot.slane %v412_v57, 2 }
 0x6b2   :  { %v417_v60 = vrot.slane %v413_v58, 1 }
 0x6b4   :  { %v418_v61 = vsel %vm187_vm8, %v417_v60, %v416_v59 }
 0x6b5   :  { %419 = vrot.lane.b32.xlu2 %v418_v61, %s1260_s0 }
 0x70f   :  { %v420_v62 = vpop.permute.xlu2 %419 }
 0x710   :  { %1050 = vmatmul.msk.f32.vlgmr.msrb.gmra.mxu1 %vm80_vm9, %v420_v62 }
 0x78d   :  { %v440_v63 = vpop.f32.mrf.mxu1 }
 0x78e   :  { %v444_v0 = vrot.slane %v440_v63, 5  ;;  %v445_v1 = vrot.slane %v440_v63, 6 }
 0x790   :  { %v448_v2 = vadd.f32 %v444_v0, %v1325_v30  ;;  %v449_v3 = vadd.f32 %v445_v1, %v1322_v28 }
 0x792   :  { %1123 = vtanh.f32 %v448_v2  ;;  %v1051_v10 = vmul.f32 -1.442695, %v448_v2  ;;  %v1052_v11 = vmul.f32 -1.442695, %v449_v3 }
 0x793   :  { %1125 = vtanh.f32 %v449_v3 }
 0x794   :  { %1127 = vpow2.f32 %v1051_v10 }
 0x795   :  { %1129 = vpow2.f32 %v1052_v11 }
 0x798   :  { %v1124_v6 = vpop.eup %1123 }
 0x799   :  { %v1126_v8 = vpop.eup %1125  ;;  %500 = vrot.lane.b32.xlu0 %v1124_v6, %s1259_s19 }
 0x79a   :  { %502 = vrot.lane.b32.xlu1 %v1126_v8, %s1259_s19  ;;  %v1128_v12 = vpop.eup %1127 }
 0x79b   :  { %v1130_v13 = vpop.eup %1129  ;;  %v456_v14 = vadd.f32 1.0, %v1128_v12 }
 0x79c   :  { %v457_v15 = vadd.f32 1.0, %v1130_v13 }
 0x79d   :  { %1131 = vrcp.f32 %v456_v14  ;;  %v469_v5 = vand.u32 2147483648, %v456_v14  ;;  %vm463_vm14 = vweird.f32 %v456_v14  ;;  %v467_v9 = vand.u32 2147483647, %v456_v14 }
 0x79e   :  { %1133 = vrcp.f32 %v457_v15  ;;  %v484_v7 = vand.u32 2147483648, %v457_v15  ;;  %vm478_vm15 = vweird.f32 %v457_v15  ;;  %v482_v25 = vand.u32 2147483647, %v457_v15 }
 0x79f   :  { %v470_v29 = vor.u32 1.1754944e-38, %v469_v5  ;;  %vm468_vm2 = vcmp.eq.f32.partialorder %v467_v9, 8.507059e+37 }
 0x7a0   :  { %v485_v31 = vor.u32 1.1754944e-38, %v484_v7  ;;  %vm483_vm3 = vcmp.eq.f32.partialorder %v482_v25, 8.507059e+37 }
 0x7a3   :  { %v1132_v16 = vpop.eup %1131 }
 0x7a4   :  { %v1134_v17 = vpop.eup %1133  ;;  %v459_v18 = vmul.f32 %v1132_v16, %v456_v14  ;;  %vm464_vm12 = vweird.f32 %v1132_v16 }
 0x7a5   :  { %v474_v19 = vmul.f32 %v1134_v17, %v457_v15  ;;  %vm479_vm13 = vweird.f32 %v1134_v17  ;;  %vm465_vm0 = vmor %vm463_vm14, %vm464_vm12 }
 0x7a6   :  { %v460_v20 = vsub.f32 1.0, %v459_v18  ;;  %vm480_vm1 = vmor %vm478_vm15, %vm479_vm13 }
 0x7a7   :  { %v475_v21 = vsub.f32 1.0, %v474_v19 }
 0x7a8   :  { %v461_v22 = vmul.f32 %v1132_v16, %v460_v20 }
 0x7a9   :  { %v476_v23 = vmul.f32 %v1134_v17, %v475_v21 }
 0x7aa   :  { %v462_v24 = vadd.f32 %v1132_v16, %v461_v22 }
 0x7ab   :  { %v477_v4 = vadd.f32 %v1134_v17, %v476_v23 }
 0x7ac   :  { %v466_v26 = vsel %vm465_vm0, %v1132_v16, %v462_v24 }
 0x7ad   :  { %v481_v27 = vsel %vm480_vm1, %v1134_v17, %v477_v4  ;;  %v471_v33 = vsel %vm468_vm2, %v470_v29, %v466_v26 }
 0x7ae   :  { %v486_v35 = vsel %vm483_vm3, %v485_v31, %v481_v27  ;;  %v496_v39 = vmul.f32 %v492_v38, %v471_v33 }
 0x7af   :  { %v497_v44 = vmul.f32 %v493_v43, %v486_v35 }
 0x80b   :  { %v501_v32 = vpop.permute.xlu0 %500 }
 0x80c   :  { %v503_v34 = vpop.permute.xlu1 %502  ;;  %v506_v36 = vmul.f32 %v501_v32, %v471_v33 }
 0x80d   :  { %v507_v37 = vmul.f32 %v503_v34, %v486_v35 }
 0x80e   :  { %510 = vrot.lane.b32.xlu2 %v506_v36, %s1260_s0 }
 0x80f   :  { %512 = vrot.lane.b32.xlu0 %v507_v37, %s1260_s0 }
 0x868   :  { %v511_v40 = vpop.permute.xlu2 %510 }
 0x869   :  { %v1392_v41 = vadd.f32 %v511_v40, %v496_v39 }
 0x86b   :  { %1135 = vtanh.f32 %v1392_v41  ;;  %v608_v36 = vrot.slane %v1392_v41, 7 }
 0x871   :  { %v1136_v42 = vpop.eup %1135 }
 0x872   :  { %522 = vrot.lane.b32.xlu1 %v1136_v42, %s1259_s19 }
 0x881   :  { %v513_v45 = vpop.permute.xlu0 %512 }
 0x882   :  { %v1397_v46 = vadd.f32 %v513_v45, %v497_v44 }
 0x884   :  { %1137 = vtanh.f32 %v1397_v46  ;;  %v609_v31 = vrot.slane %v1397_v46, 7 }
 0x88a   :  { %v1138_v47 = vpop.eup %1137 }
 0x88b   :  { %524 = vrot.lane.b32.xlu2 %v1138_v47, %s1259_s19 }
 0x8e4   :  { %v523_v48 = vpop.permute.xlu1 %522 }
 0x8e5   :  { %v525_v49 = vpop.permute.xlu2 %524  ;;  %v528_v50 = vmul.f32 %v523_v48, %v471_v33 }
 0x8e6   :  { %v529_v51 = vmul.f32 %v525_v49, %v486_v35 }
 0x8e7   :  { %v532_v53 = vrot.slane %v528_v50, 3 }
 0x8e8   :  { %v533_v54 = vrot.slane %v529_v51, 2 }
 0x8ea   :  { %v534_v55 = vsel %vm187_vm8, %v533_v54, %v532_v53 }
 0x8eb   :  { %535 = vrot.lane.b32.xlu0 %v534_v55, %s1260_s0 }
 0x95d   :  { %v536_v52 = vpop.permute.xlu0 %535 }
 0x95e   :  { %1053 = vmatmul.msk.f32.vlgmr.msrb.gmra.mxu2 %vm80_vm9, %v536_v52 }
 0x9e1   :  { %v556_v56 = vpop.f32.mrf.mxu2 }
 0x9e2   :  { %v560_v57 = vrot.slane %v556_v56, 4  ;;  %v561_v58 = vrot.slane %v556_v56, 5 }
 0x9e4   :  { %v564_v59 = vadd.f32 %v560_v57, %v1325_v30  ;;  %v565_v60 = vadd.f32 %v561_v58, %v1322_v28 }
 0x9e6   :  { %1139 = vtanh.f32 %v564_v59  ;;  %v1055_v63 = vmul.f32 -1.442695, %v565_v60  ;;  %v1054_v3 = vmul.f32 -1.442695, %v564_v59 }
 0x9e7   :  { %1141 = vtanh.f32 %v565_v60 }
 0x9e8   :  { %1143 = vpow2.f32 %v1055_v63 }
 0x9ec   :  { %v1140_v61 = vpop.eup %1139 }
 0x9ed   :  { %v1142_v62 = vpop.eup %1141  ;;  %616 = vrot.lane.b32.xlu1 %v1140_v61, %s1259_s19 }
 0x9ee   :  { %618 = vrot.lane.b32.xlu2 %v1142_v62, %s1259_s19  ;;  %v1144_v0 = vpop.eup %1143 }
 0x9ef   :  { %v573_v1 = vadd.f32 1.0, %v1144_v0 }
 0x9f1   :  { %1145 = vrcp.f32 %v573_v1  ;;  %v600_v14 = vand.u32 2147483648, %v573_v1  ;;  %vm594_vm5 = vweird.f32 %v573_v1  ;;  %v598_v15 = vand.u32 2147483647, %v573_v1 }
 0x9f2   :  { %1147 = vpow2.f32 %v1054_v3 }
 0x9f3   :  { %v601_v17 = vor.u32 1.1754944e-38, %v600_v14  ;;  %vm599_vm7 = vcmp.eq.f32.partialorder %v598_v15, 8.507059e+37 }
 0x9f7   :  { %v1146_v2 = vpop.eup %1145 }
 0x9f8   :  { %v590_v6 = vmul.f32 %v1146_v2, %v573_v1  ;;  %v1148_v10 = vpop.eup %1147  ;;  %vm595_vm4 = vweird.f32 %v1146_v2 }
 0x9f9   :  { %v572_v12 = vadd.f32 1.0, %v1148_v10  ;;  %vm596_vm6 = vmor %vm594_vm5, %vm595_vm4 }
 0x9fa   :  { %v591_v8 = vsub.f32 1.0, %v590_v6 }
 0x9fb   :  { %1149 = vrcp.f32 %v572_v12  ;;  %v585_v5 = vand.u32 2147483648, %v572_v12  ;;  %vm579_vm11 = vweird.f32 %v572_v12  ;;  %v583_v7 = vand.u32 2147483647, %v572_v12 }
 0x9fc   :  { %v592_v11 = vmul.f32 %v1146_v2, %v591_v8 }
 0x9fd   :  { %v586_v25 = vor.u32 1.1754944e-38, %v585_v5  ;;  %vm584_vm13 = vcmp.eq.f32.partialorder %v583_v7, 8.507059e+37 }
 0x9fe   :  { %v593_v13 = vadd.f32 %v1146_v2, %v592_v11 }
 0xa00   :  { %v597_v16 = vsel %vm596_vm6, %v1146_v2, %v593_v13 }
 0xa01   :  { %v602_v19 = vsel %vm599_vm7, %v601_v17, %v597_v16  ;;  %v1150_v20 = vpop.eup %1149 }
 0xa02   :  { %v575_v22 = vmul.f32 %v1150_v20, %v572_v12  ;;  %vm580_vm10 = vweird.f32 %v1150_v20  ;;  %v613_v32 = vmul.f32 %v609_v31, %v602_v19 }
 0xa03   :  { %vm581_vm12 = vmor %vm579_vm11, %vm580_vm10 }
 0xa04   :  { %v576_v23 = vsub.f32 1.0, %v575_v22 }
 0xa06   :  { %v577_v24 = vmul.f32 %v1150_v20, %v576_v23 }
 0xa08   :  { %v578_v4 = vadd.f32 %v1150_v20, %v577_v24 }
 0xa0a   :  { %v582_v9 = vsel %vm581_vm12, %v1150_v20, %v578_v4 }
 0xa0b   :  { %v587_v27 = vsel %vm584_vm13, %v586_v25, %v582_v9 }
 0xa0c   :  { %v612_v37 = vmul.f32 %v608_v36, %v587_v27 }
 0xa48   :  { %v619_v18 = vpop.permute.xlu2 %618 }
 0xa49   :  { %v623_v21 = vmul.f32 %v619_v18, %v602_v19 }
 0xa4b   :  { %628 = vrot.lane.b32.xlu1 %v623_v21, %s1260_s0 }
 0xa5f   :  { %v617_v26 = vpop.permute.xlu1 %616 }
 0xa60   :  { %v622_v29 = vmul.f32 %v617_v26, %v587_v27 }
 0xa62   :  { %626 = vrot.lane.b32.xlu0 %v622_v29, %s1260_s0 }
 0xabd   :  { %v629_v33 = vpop.permute.xlu1 %628 }
 0xabe   :  { %v1411_v34 = vadd.f32 %v629_v33, %v613_v32 }
 0xac0   :  { %1151 = vtanh.f32 %v1411_v34  ;;  %v725_v7 = vrot.slane %v1411_v34, 7 }
 0xac6   :  { %v1152_v35 = vpop.eup %1151 }
 0xac7   :  { %640 = vrot.lane.b32.xlu0 %v1152_v35, %s1259_s19 }
 0xad4   :  { %v627_v38 = vpop.permute.xlu0 %626 }
 0xad5   :  { %v1416_v39 = vadd.f32 %v627_v38, %v612_v37 }
 0xad7   :  { %1153 = vtanh.f32 %v1416_v39  ;;  %v724_v5 = vrot.slane %v1416_v39, 7 }
 0xadd   :  { %v1154_v40 = vpop.eup %1153 }
 0xade   :  { %638 = vrot.lane.b32.xlu2 %v1154_v40, %s1259_s19 }
 0xb38   :  { %v639_v42 = vpop.permute.xlu2 %638 }
 0xb39   :  { %v641_v43 = vpop.permute.xlu0 %640  ;;  %v644_v44 = vmul.f32 %v639_v42, %v587_v27 }
 0xb3a   :  { %v645_v45 = vmul.f32 %v641_v43, %v602_v19 }
 0xb3b   :  { %v648_v46 = vrot.slane %v644_v44, 4 }
 0xb3c   :  { %v649_v47 = vrot.slane %v645_v45, 3 }
 0xb3e   :  { %v650_v48 = vsel %vm187_vm8, %v649_v47, %v648_v46 }
 0xb3f   :  { %651 = vrot.lane.b32.xlu1 %v650_v48, %s1260_s0 }
 0xbb1   :  { %v652_v41 = vpop.permute.xlu1 %651 }
 0xbb2   :  { %1056 = vmatmul.msk.f32.vlgmr.msrb.gmra.mxu3 %vm80_vm9, %v652_v41 }
 0xc35   :  { %v672_v49 = vpop.f32.mrf.mxu3 }
 0xc36   :  { %v676_v50 = vrot.slane %v672_v49, 3  ;;  %v677_v51 = vrot.slane %v672_v49, 4 }
 0xc38   :  { %v680_v53 = vadd.f32 %v676_v50, %v1325_v30  ;;  %v681_v54 = vadd.f32 %v677_v51, %v1322_v28 }
 0xc3a   :  { %1155 = vtanh.f32 %v680_v53  ;;  %v1057_v56 = vmul.f32 -1.442695, %v680_v53  ;;  %v1058_v60 = vmul.f32 -1.442695, %v681_v54 }
 0xc3b   :  { %1157 = vtanh.f32 %v681_v54 }
 0xc3c   :  { %1159 = vpow2.f32 %v1057_v56 }
 0xc40   :  { %v1156_v55 = vpop.eup %1155 }
 0xc41   :  { %v1158_v52 = vpop.eup %1157  ;;  %732 = vrot.lane.b32.xlu2 %v1156_v55, %s1259_s19 }
 0xc42   :  { %734 = vrot.lane.b32.xlu0 %v1158_v52, %s1259_s19  ;;  %v1160_v57 = vpop.eup %1159 }
 0xc43   :  { %v688_v58 = vadd.f32 1.0, %v1160_v57 }
 0xc45   :  { %1161 = vrcp.f32 %v688_v58  ;;  %v701_v3 = vand.u32 2147483648, %v688_v58  ;;  %vm695_vm15 = vweird.f32 %v688_v58  ;;  %v699_v6 = vand.u32 2147483647, %v688_v58 }
 0xc46   :  { %1163 = vpow2.f32 %v1058_v60 }
 0xc47   :  { %v702_v10 = vor.u32 1.1754944e-38, %v701_v3  ;;  %vm700_vm1 = vcmp.eq.f32.partialorder %v699_v6, 8.507059e+37 }
 0xc4b   :  { %v1162_v59 = vpop.eup %1161 }
 0xc4c   :  { %v691_v61 = vmul.f32 %v1162_v59, %v688_v58  ;;  %v1164_v0 = vpop.eup %1163  ;;  %vm696_vm14 = vweird.f32 %v1162_v59 }
 0xc4d   :  { %v689_v1 = vadd.f32 1.0, %v1164_v0  ;;  %vm697_vm0 = vmor %vm695_vm15, %vm696_vm14 }
 0xc4e   :  { %v692_v62 = vsub.f32 1.0, %v691_v61 }
 0xc4f   :  { %1165 = vrcp.f32 %v689_v1  ;;  %v716_v19 = vand.u32 2147483648, %v689_v1  ;;  %vm710_vm3 = vweird.f32 %v689_v1  ;;  %v714_v20 = vand.u32 2147483647, %v689_v1 }
 0xc50   :  { %v693_v63 = vmul.f32 %v1162_v59, %v692_v62 }
 0xc51   :  { %v717_v22 = vor.u32 1.1754944e-38, %v716_v19  ;;  %vm715_vm5 = vcmp.eq.f32.partialorder %v714_v20, 8.507059e+37 }
 0xc52   :  { %v694_v2 = vadd.f32 %v1162_v59, %v693_v63 }
 0xc54   :  { %v698_v8 = vsel %vm697_vm0, %v1162_v59, %v694_v2 }
 0xc55   :  { %v703_v12 = vsel %vm700_vm1, %v702_v10, %v698_v8  ;;  %v1166_v14 = vpop.eup %1165 }
 0xc56   :  { %v706_v15 = vmul.f32 %v1166_v14, %v689_v1  ;;  %vm711_vm2 = vweird.f32 %v1166_v14  ;;  %v728_v9 = vmul.f32 %v724_v5, %v703_v12 }
 0xc57   :  { %vm712_vm4 = vmor %vm710_vm3, %vm711_vm2 }
 0xc58   :  { %v707_v16 = vsub.f32 1.0, %v706_v15 }
 0xc5a   :  { %v708_v17 = vmul.f32 %v1166_v14, %v707_v16 }
 0xc5c   :  { %v709_v18 = vadd.f32 %v1166_v14, %v708_v17 }
 0xc5e   :  { %v713_v21 = vsel %vm712_vm4, %v1166_v14, %v709_v18 }
 0xc5f   :  { %v718_v24 = vsel %vm715_vm5, %v717_v22, %v713_v21 }
 0xc60   :  { %v729_v25 = vmul.f32 %v725_v7, %v718_v24 }
 0xc9b   :  { %v733_v11 = vpop.permute.xlu2 %732 }
 0xc9c   :  { %v738_v13 = vmul.f32 %v733_v11, %v703_v12 }
 0xc9e   :  { %742 = vrot.lane.b32.xlu1 %v738_v13, %s1260_s0 }
 0xcb4   :  { %v735_v23 = vpop.permute.xlu0 %734 }
 0xcb5   :  { %v739_v4 = vmul.f32 %v735_v23, %v718_v24 }
 0xcb7   :  { %744 = vrot.lane.b32.xlu2 %v739_v4, %s1260_s0 }
 0xd10   :  { %v743_v26 = vpop.permute.xlu1 %742 }
 0xd11   :  { %v745_v27 = vpop.permute.xlu2 %744  ;;  %v1431_v29 = vadd.f32 %v743_v26, %v728_v9 }
 0xd12   :  { %v1433_v31 = vadd.f32 %v745_v27, %v729_v25 }
 0xd13   :  { %1167 = vtanh.f32 %v1431_v29  ;;  %v840_v19 = vrot.slane %v1431_v29, 7 }
 0xd14   :  { %1169 = vtanh.f32 %v1433_v31 }
 0xd19   :  { %v1168_v32 = vpop.eup %1167 }
 0xd1a   :  { %v1170_v33 = vpop.eup %1169  ;;  %754 = vrot.lane.b32.xlu0 %v1168_v32, %s1259_s19 }
 0xd1b   :  { %756 = vrot.lane.b32.xlu1 %v1170_v33, %s1259_s19 }
 0xd8c   :  { %v755_v35 = vpop.permute.xlu0 %754 }
 0xd8d   :  { %v757_v34 = vpop.permute.xlu1 %756  ;;  %v760_v36 = vmul.f32 %v755_v35, %v703_v12 }
 0xd8e   :  { %v761_v37 = vmul.f32 %v757_v34, %v718_v24  ;;  %v841_v24 = vrot.slane %v1433_v31, 7 }
 0xd8f   :  { %v764_v38 = vrot.slane %v760_v36, 5 }
 0xd90   :  { %v765_v39 = vrot.slane %v761_v37, 4 }
 0xd92   :  { %v766_v40 = vsel %vm187_vm8, %v765_v39, %v764_v38 }
 0xd93   :  { %767 = vrot.lane.b32.xlu2 %v766_v40, %s1260_s0 }
 0xded   :  { %v768_v42 = vpop.permute.xlu2 %767 }
 0xdee   :  { %1059 = vmatmul.msk.f32.vlgmr.msra.gmra.mxu1 %vm80_vm9, %v768_v42 }
 0xe6b   :  { %v788_v43 = vpop.f32.mrf.mxu1 }
 0xe6c   :  { %v792_v44 = vrot.slane %v788_v43, 2  ;;  %v793_v45 = vrot.slane %v788_v43, 3 }
 0xe6e   :  { %v796_v46 = vadd.f32 %v792_v44, %v1325_v30  ;;  %v797_v47 = vadd.f32 %v793_v45, %v1322_v28 }
 0xe70   :  { %1171 = vtanh.f32 %v796_v46  ;;  %v1060_v49 = vmul.f32 -1.442695, %v796_v46  ;;  %v1061_v50 = vmul.f32 -1.442695, %v797_v47 }
 0xe71   :  { %1173 = vtanh.f32 %v797_v47 }
 0xe72   :  { %1175 = vpow2.f32 %v1060_v49 }
 0xe73   :  { %1177 = vpow2.f32 %v1061_v50 }
 0xe76   :  { %v1172_v48 = vpop.eup %1171 }
 0xe77   :  { %v1174_v41 = vpop.eup %1173  ;;  %848 = vrot.lane.b32.xlu0 %v1172_v48, %s1259_s19 }
 0xe78   :  { %850 = vrot.lane.b32.xlu1 %v1174_v41, %s1259_s19  ;;  %v1176_v51 = vpop.eup %1175 }
 0xe79   :  { %v1178_v53 = vpop.eup %1177  ;;  %v804_v54 = vadd.f32 1.0, %v1176_v51 }
 0xe7a   :  { %v805_v55 = vadd.f32 1.0, %v1178_v53 }
 0xe7b   :  { %1179 = vrcp.f32 %v804_v54  ;;  %v817_v1 = vand.u32 2147483648, %v804_v54  ;;  %vm811_vm10 = vweird.f32 %v804_v54  ;;  %v815_v3 = vand.u32 2147483647, %v804_v54 }
 0xe7c   :  { %1181 = vrcp.f32 %v805_v55  ;;  %v832_v2 = vand.u32 2147483648, %v805_v55  ;;  %vm826_vm11 = vweird.f32 %v805_v55  ;;  %v830_v6 = vand.u32 2147483647, %v805_v55 }
 0xe7d   :  { %v818_v11 = vor.u32 1.1754944e-38, %v817_v1  ;;  %vm816_vm14 = vcmp.eq.f32.partialorder %v815_v3, 8.507059e+37 }
 0xe7e   :  { %v833_v12 = vor.u32 1.1754944e-38, %v832_v2  ;;  %vm831_vm15 = vcmp.eq.f32.partialorder %v830_v6, 8.507059e+37 }
 0xe81   :  { %v1180_v52 = vpop.eup %1179 }
 0xe82   :  { %v1182_v56 = vpop.eup %1181  ;;  %v807_v57 = vmul.f32 %v1180_v52, %v804_v54  ;;  %vm812_vm6 = vweird.f32 %v1180_v52 }
 0xe83   :  { %v822_v58 = vmul.f32 %v1182_v56, %v805_v55  ;;  %vm827_vm7 = vweird.f32 %v1182_v56  ;;  %vm813_vm12 = vmor %vm811_vm10, %vm812_vm6 }
 0xe84   :  { %v808_v59 = vsub.f32 1.0, %v807_v57  ;;  %vm828_vm13 = vmor %vm826_vm11, %vm827_vm7 }
 0xe85   :  { %v823_v60 = vsub.f32 1.0, %v822_v58 }
 0xe86   :  { %v809_v61 = vmul.f32 %v1180_v52, %v808_v59 }
 0xe87   :  { %v824_v62 = vmul.f32 %v1182_v56, %v823_v60 }
 0xe88   :  { %v810_v63 = vadd.f32 %v1180_v52, %v809_v61 }
 0xe89   :  { %v825_v0 = vadd.f32 %v1182_v56, %v824_v62 }
 0xe8a   :  { %v814_v8 = vsel %vm813_vm12, %v1180_v52, %v810_v63 }
 0xe8b   :  { %v829_v10 = vsel %vm828_vm13, %v1182_v56, %v825_v0  ;;  %v819_v14 = vsel %vm816_vm14, %v818_v11, %v814_v8 }
 0xe8c   :  { %v834_v16 = vsel %vm831_vm15, %v833_v12, %v829_v10  ;;  %v844_v20 = vmul.f32 %v840_v19, %v819_v14 }
 0xe8d   :  { %v845_v4 = vmul.f32 %v841_v24, %v834_v16  ;;  %v49_v24 = vld [vmem:[#allocation2 + $0xa8] sm:$0xff] }
 0xee9   :  { %v849_v13 = vpop.permute.xlu0 %848 }
 0xeea   :  { %v851_v15 = vpop.permute.xlu1 %850  ;;  %v854_v17 = vmul.f32 %v849_v13, %v819_v14 }
 0xeeb   :  { %v855_v18 = vmul.f32 %v851_v15, %v834_v16 }
 0xeec   :  { %858 = vrot.lane.b32.xlu2 %v854_v17, %s1260_s0 }
 0xeed   :  { %860 = vrot.lane.b32.xlu0 %v855_v18, %s1260_s0 }
 0xf46   :  { %v859_v21 = vpop.permute.xlu2 %858 }
 0xf47   :  { %v1449_v22 = vadd.f32 %v859_v21, %v844_v20  ;;  %v52_v20 = vld [vmem:[#allocation2 + $0xc0] sm:$0xff]  ;;  %v51_v21 = vld [vmem:[#allocation2 + $0xb8] sm:$0xff] }
 0xf48   :  { %1016 = vmatpush.msra.mxu3 %v52_v20 }
 0xf49   :  { %1183 = vtanh.f32 %v1449_v22  ;;  %v956_v15 = vrot.slane %v1449_v22, 7 }
 0xf4a   :  { %1017 = vmatpush.msra.mxu3 %v51_v21 }
 0xf4f   :  { %v1184_v23 = vpop.eup %1183 }
 0xf50   :  { %870 = vrot.lane.b32.xlu1 %v1184_v23, %s1259_s19  ;;  %v50_v23 = vld [vmem:[#allocation2 + $0xb0] sm:$0xff] }
 0xf51   :  { %1018 = vmatpush.msra.mxu3 %v50_v23 }
 0xf53   :  { %1019 = vmatpush.msra.mxu3 %v49_v24 }
 0xf5f   :  { %v861_v5 = vpop.permute.xlu0 %860 }
 0xf60   :  { %v1454_v7 = vadd.f32 %v861_v5, %v845_v4 }
 0xf62   :  { %1185 = vtanh.f32 %v1454_v7  ;;  %v957_v10 = vrot.slane %v1454_v7, 7 }
 0xf68   :  { %v1186_v9 = vpop.eup %1185 }
 0xf69   :  { %872 = vrot.lane.b32.xlu2 %v1186_v9, %s1259_s19 }
 0xfc2   :  { %v871_v25 = vpop.permute.xlu1 %870 }
 0xfc3   :  { %v873_v26 = vpop.permute.xlu2 %872  ;;  %v876_v27 = vmul.f32 %v871_v25, %v819_v14 }
 0xfc4   :  { %v877_v29 = vmul.f32 %v873_v26, %v834_v16 }
 0xfc5   :  { %v880_v32 = vrot.slane %v876_v27, 6 }
 0xfc6   :  { %v881_v33 = vrot.slane %v877_v29, 5  ;;  %v1074_v29 = vld [vmem:[#allocation2 + $0xc8] ss:$0 sm:$0xff] }
 0xfc8   :  { %v882_v35 = vsel %vm187_vm8, %v881_v33, %v880_v32 }
 0xfc9   :  { %883 = vrot.lane.b32.xlu0 %v882_v35, %s1260_s0 }
0x103b   :  { %v884_v31 = vpop.permute.xlu0 %883 }
0x103c   :  { %1062 = vmatmul.msk.f32.vlgmr.msra.gmra.mxu2 %vm80_vm9, %v884_v31 }
0x10bf   :  { %v904_v34 = vpop.f32.mrf.mxu2 }
0x10c0   :  { %v908_v36 = vrot.slane %v904_v34, 1  ;;  %v909_v37 = vrot.slane %v904_v34, 2 }
0x10c2   :  { %v912_v38 = vadd.f32 %v908_v36, %v1325_v30  ;;  %v913_v39 = vadd.f32 %v909_v37, %v1322_v28 }
0x10c4   :  { %1187 = vtanh.f32 %v912_v38  ;;  %v1064_v43 = vmul.f32 -1.442695, %v913_v39  ;;  %v1063_v47 = vmul.f32 -1.442695, %v912_v38 }
0x10c5   :  { %1189 = vtanh.f32 %v913_v39 }
0x10c6   :  { %1191 = vpow2.f32 %v1064_v43 }
0x10ca   :  { %v1188_v40 = vpop.eup %1187 }
0x10cb   :  { %v1190_v42 = vpop.eup %1189  ;;  %964 = vrot.lane.b32.xlu1 %v1188_v40, %s1259_s19 }
0x10cc   :  { %966 = vrot.lane.b32.xlu2 %v1190_v42, %s1259_s19  ;;  %v1192_v44 = vpop.eup %1191 }
0x10cd   :  { %v921_v45 = vadd.f32 1.0, %v1192_v44 }
0x10cf   :  { %1193 = vrcp.f32 %v921_v45  ;;  %v948_v51 = vand.u32 2147483648, %v921_v45  ;;  %vm942_vm1 = vweird.f32 %v921_v45  ;;  %v946_v53 = vand.u32 2147483647, %v921_v45 }
0x10d0   :  { %1195 = vpow2.f32 %v1063_v47 }
0x10d1   :  { %v949_v55 = vor.u32 1.1754944e-38, %v948_v51  ;;  %vm947_vm3 = vcmp.eq.f32.partialorder %v946_v53, 8.507059e+37 }
0x10d5   :  { %v1194_v46 = vpop.eup %1193 }
0x10d6   :  { %v938_v48 = vmul.f32 %v1194_v46, %v921_v45  ;;  %v1196_v41 = vpop.eup %1195  ;;  %vm943_vm0 = vweird.f32 %v1194_v46 }
0x10d7   :  { %v920_v49 = vadd.f32 1.0, %v1196_v41  ;;  %vm944_vm2 = vmor %vm942_vm1, %vm943_vm0 }
0x10d8   :  { %v939_v30 = vsub.f32 1.0, %v938_v48 }
0x10d9   :  { %1197 = vrcp.f32 %v920_v49  ;;  %v933_v63 = vand.u32 2147483648, %v920_v49  ;;  %vm927_vm5 = vweird.f32 %v920_v49  ;;  %v931_v0 = vand.u32 2147483647, %v920_v49 }
0x10da   :  { %v940_v28 = vmul.f32 %v1194_v46, %v939_v30 }
0x10db   :  { %v934_v2 = vor.u32 1.1754944e-38, %v933_v63  ;;  %vm932_vm7 = vcmp.eq.f32.partialorder %v931_v0, 8.507059e+37 }
0x10dc   :  { %v941_v50 = vadd.f32 %v1194_v46, %v940_v28 }
0x10de   :  { %v945_v54 = vsel %vm944_vm2, %v1194_v46, %v941_v50 }
0x10df   :  { %v950_v56 = vsel %vm947_vm3, %v949_v55, %v945_v54  ;;  %v1198_v57 = vpop.eup %1197 }
0x10e0   :  { %v923_v59 = vmul.f32 %v1198_v57, %v920_v49  ;;  %vm928_vm4 = vweird.f32 %v1198_v57  ;;  %v961_v11 = vmul.f32 %v957_v10, %v950_v56 }
0x10e1   :  { %vm929_vm6 = vmor %vm927_vm5, %vm928_vm4 }
0x10e2   :  { %v924_v60 = vsub.f32 1.0, %v923_v59 }
0x10e4   :  { %v925_v61 = vmul.f32 %v1198_v57, %v924_v60 }
0x10e6   :  { %v926_v62 = vadd.f32 %v1198_v57, %v925_v61 }
0x10e8   :  { %v930_v1 = vsel %vm929_vm6, %v1198_v57, %v926_v62 }
0x10e9   :  { %v935_v6 = vsel %vm932_vm7, %v934_v2, %v930_v1 }
0x10ea   :  { %v960_v16 = vmul.f32 %v956_v15, %v935_v6 }
0x1126   :  { %v967_v52 = vpop.permute.xlu2 %966 }
0x1127   :  { %v971_v58 = vmul.f32 %v967_v52, %v950_v56 }
0x1129   :  { %976 = vrot.lane.b32.xlu1 %v971_v58, %s1260_s0 }
0x113d   :  { %v965_v3 = vpop.permute.xlu1 %964 }
0x113e   :  { %v970_v8 = vmul.f32 %v965_v3, %v935_v6 }
0x1140   :  { %974 = vrot.lane.b32.xlu0 %v970_v8, %s1260_s0 }
0x119b   :  { %v977_v12 = vpop.permute.xlu1 %976 }
0x119c   :  { %v981_v13 = vadd.f32 %v977_v12, %v961_v11 }
0x119e   :  { %1199 = vtanh.f32 %v981_v13 }
0x11a4   :  { %v1200_v14 = vpop.eup %1199 }
0x11a5   :  { %988 = vrot.lane.b32.xlu0 %v1200_v14, %s1259_s19 }
0x11b2   :  { %v975_v17 = vpop.permute.xlu0 %974 }
0x11b3   :  { %v980_v18 = vadd.f32 %v975_v17, %v960_v16 }
0x11b5   :  { %1201 = vtanh.f32 %v980_v18 }
0x11bb   :  { %v1202_v19 = vpop.eup %1201 }
0x11bc   :  { %986 = vrot.lane.b32.xlu2 %v1202_v19, %s1259_s19 }
0x1216   :  { %v987_v4 = vpop.permute.xlu2 %986 }
0x1217   :  { %v989_v5 = vpop.permute.xlu0 %988  ;;  %v992_v7 = vmul.f32 %v987_v4, %v935_v6 }
0x1218   :  { %v993_v9 = vmul.f32 %v989_v5, %v950_v56 }
0x1219   :  { %v997_v22 = vrot.slane %v992_v7, 7 }
0x121a   :  { %v998_v25 = vrot.slane %v993_v9, 6 }
0x121c   :  { %v999_v26 = vsel %vm187_vm8, %v998_v25, %v997_v22 }
0x121d   :  { %1000 = vrot.lane.b32.xlu1 %v999_v26, %s1260_s0 }
0x128f   :  { %v1001_v27 = vpop.permute.xlu1 %1000 }
0x1290   :  { %1065 = vmatmul.msk.f32.vlgmr.msra.gmra.mxu3 %vm80_vm9, %v1001_v27 }
0x1313   :  { %v1021_v32 = vpop.f32.mrf.mxu3 }
0x1314   :  { %v1022_v33 = vadd.f32 %v1074_v29, %v1021_v32 }
0x1316   :  { %1024 = vst [vmem:[#allocation5] sm:$0x3] %v1022_v33 }
0x1317   :  { %1035 = dma.vmem_to_hbm [thread:$0]  %s1031_s21, 32, %s1033_s24, [#allocation4]  }
0x1318   :  { %1253 = dma.done.wait [#allocation4], 32  }
0x1319   :  { %1254 = vsyncadd [#allocation4], 4294967264 }
0x131a   :  { %1040 = vsyncpa [#allocation3], 1 }
0x131b   :  { %1041 = vsyncpa [#allocation4], 1 }

</bundles_post_ra>
